<compile_context>
chip_gen: v7x
topology: tpu7x:2x2x1
jax: 0.10.0
libtpu: 0.0.40
codegen_flags: <defaults>
</compile_context>

<pallas_src>
import functools
import math

import jax
import jax.numpy as jnp
import numpy as np
from jax import lax
from jax.experimental import pallas as pl
from jax.experimental.pallas import tpu as pltpu


def _round_up(x, m):
    return ((x + m - 1) // m) * m


# ----------------------------------------------------------------------------
# Rotation-matrix construction (elementwise glue, mirrors the PyTorch code)
# ----------------------------------------------------------------------------
def _get_rotation_matrix(thetas):
    bs, g = thetas.shape
    t = thetas.reshape(-1)  # (bs*g,)
    x = jnp.cos(t)
    y = jnp.sin(t)
    a = x - y
    b = x * y
    c = x + y
    z = jnp.zeros_like(t)
    o = jnp.ones_like(t)

    pos = [
        [a, 1 - a, z, z, z, z, z, z, z],
        [z, x - b, b, z, 1 - c + b, y - b, z, z, z],
        [z, z, a, z, z, 1 - a, z, z, z],
        [b, y - b, z, x - b, 1 - c + b, z, z, z, z],
        [z, z, z, z, o, z, z, z, z],
        [z, z, z, z, 1 - c + b, x - b, z, y - b, b],
        [z, z, z, 1 - a, z, z, a, z, z],
        [z, z, z, y - b, 1 - c + b, z, b, x - b, z],
        [z, z, z, z, z, z, z, 1 - a, a],
    ]
    neg = [
        [c, z, z, 1 - c, z, z, z, z, z],
        [-b, x + b, z, b - y, 1 - a - b, z, z, z, z],
        [z, 1 - c, c, z, z, z, z, z, z],
        [z, z, z, x + b, 1 - a - b, z, -b, b - y, z],
        [z, z, z, z, o, z, z, z, z],
        [z, b - y, -b, z, 1 - a - b, x + b, z, z, z],
        [z, z, z, z, z, z, c, 1 - c, z],
        [z, z, z, z, 1 - a - b, b - y, z, x + b, -b],
        [z, z, z, z, z, 1 - c, z, z, c],
    ]
    pos_m = jnp.stack([jnp.stack(r, axis=0) for r in pos], axis=0)  # (9,9,bs*g)
    neg_m = jnp.stack([jnp.stack(r, axis=0) for r in neg], axis=0)  # (9,9,bs*g)
    mask = (t >= 0).astype(thetas.dtype)[None, None, :]
    rot = mask * pos_m + (1.0 - mask) * neg_m
    rot = jnp.transpose(rot, (2, 0, 1)).reshape(bs, g, 9, 9)
    return rot


# ----------------------------------------------------------------------------
# Pallas kernel 1: rotated-weight construction, tiled over Cout*Cin
# ----------------------------------------------------------------------------
def _rot_mm_kernel(a_ref, b_ref, o_ref):
    o_ref[...] = jnp.dot(
        a_ref[...], b_ref[...], preferred_element_type=jnp.float32
    ).astype(o_ref.dtype)


def _pallas_mm_n_tiled(a, b, tn=512):
    """(M, K) @ (K, N) -> (M, N) in f32.  The small (M, K) rot matrix stays
    resident; only a (K, TN) + (M, TN) tile pair lives in VMEM per step."""
    M, K = a.shape
    K2, N = b.shape
    assert K == K2
    if N <= tn:
        TN, Np = N, N              # single full block (exempt from 128 rule)
    else:
        TN = tn                    # multiple of 128
        Np = _round_up(N, TN)
    bp = b if Np == N else jnp.pad(b, ((0, 0), (0, Np - N)))
    out = pl.pallas_call(
        _rot_mm_kernel,
        out_shape=jax.ShapeDtypeStruct((M, Np), jnp.float32),
        grid=(Np // TN,),
        in_specs=[
            pl.BlockSpec((M, K), lambda j: (0, 0)),
            pl.BlockSpec((K, TN), lambda j: (0, j)),
        ],
        out_specs=pl.BlockSpec((M, TN), lambda j: (0, j)),
        compiler_params=pltpu.CompilerParams(
            dimension_semantics=("parallel",)),
    )(a, bp)
    return out if Np == N else out[:, :N]


def rotate_weights_tap_major(weights, lambdas, thetas):
    """weights: (n, Cout, Cin, k, k) -> (b, k*k, Cout, Cin), tap-major.

    Same numbers as PyTorch batch_rotate_multiweight (trainable=False), just a
    layout change: torch's (b*Cout, Cin, kh, kw) == out[b, kh*k+kw, co, ci].
    """
    n, Cout, Cin, k, _ = weights.shape
    b = thetas.shape[0]
    assert lambdas.shape == thetas.shape and lambdas.shape[1] == n
    rot = _get_rotation_matrix(thetas) * lambdas[:, :, None, None]    # (b,n,9,9)
    rot = jnp.transpose(rot, (0, 2, 1, 3)).reshape(b * k * k, n * k * k)
    wmat = jnp.transpose(weights, (0, 3, 4, 1, 2)).reshape(n * k * k, Cout * Cin)
    out = _pallas_mm_n_tiled(rot, wmat)                               # (b*9, Cout*Cin)
    return out.reshape(b, k * k, Cout, Cin)                           # no transpose


# ----------------------------------------------------------------------------
# Pallas kernel 2: fused grouped conv (groups = batch) via flat tap shifts
# ----------------------------------------------------------------------------
def _arc_conv_kernel(x_hbm, w_ref, o_ref, xbuf, sem, *, TM, TMH, tap_offsets):
    # x_hbm : (bs, Cin, Lpad) in HBM (manual slab DMA)
    # w_ref : (k*k, Cout, Cin) VMEM block for this batch (auto-pipelined)
    # o_ref : (Cout, TM) lane-dense output block
    b = pl.program_id(0)
    m = pl.program_id(1)
    start = pl.multiple_of(m * TM, 128)

    # One slab (taps overlap almost completely, so read the activation once).
    cp = pltpu.make_async_copy(x_hbm.at[b, :, pl.ds(start, TMH)], xbuf, sem)
    cp.start()
    cp.wait()

    off0 = tap_offsets[0]
    acc = jnp.dot(w_ref[0], xbuf[:, off0:off0 + TM],
                  preferred_element_type=jnp.float32)
    for t in range(1, len(tap_offsets)):            # 9 taps, unrolled
        off = tap_offsets[t]
        acc = acc + jnp.dot(w_ref[t], xbuf[:, off:off + TM],
                            preferred_element_type=jnp.float32)
    o_ref[...] = acc.astype(o_ref.dtype)


# ----------------------------------------------------------------------------
# AdaptiveRotatedConv2d forward
# ----------------------------------------------------------------------------
def adaptive_rotated_conv2d(x, weight, alphas, angles, *, stride=1, padding=1,
                            tile_m=512, compute_dtype=None):
    """x: (bs, Cin, H, W) NCHW; weight: (n, Cout, Cin, k, k) -> (bs, Cout, Ho, Wo)."""
    # TODO(synk): dilation != 1 and groups != 1 (module defaults) are not implemented.
    bs, Cin, H, W = x.shape
    n, Cout, Cin_w, k, _ = weight.shape
    assert Cin_w == Cin

    # Tap-major rotated weights (bs, k*k, Cout, Cin) — fed straight to the conv kernel.
    w_taps = rotate_weights_tap_major(weight, alphas, angles)

    Hp, Wp = H + 2 * padding, W + 2 * padding
    Hout1, Wout1 = Hp - k + 1, Wp - k + 1          # stride-1 output extent
    assert Hout1 > 0 and Wout1 > 0

    M = Hout1 * Wp                                 # flat stride-1 positions (k-1 junk cols/row)
    halo = (k - 1) * Wp + (k - 1)                  # max flat tap offset
    TM = _round_up(min(tile_m, _round_up(M, 128)), 128)
    Mpad = _round_up(M, TM)
    TMH = TM + halo
    Lpad = Mpad + halo
    nM = Mpad // TM

    # Flatten padded activations: tap (kh, kw) == constant shift kh*Wp+kw.
    xp = jnp.pad(x, ((0, 0), (0, 0), (padding, padding), (padding, padding)))
    xf = xp.reshape(bs, Cin, Hp * Wp)
    xf = jnp.pad(xf, ((0, 0), (0, 0), (0, Lpad - Hp * Wp)))

    if compute_dtype is not None:                  # bf16 MXU path (f32 accumulate)
        xf = xf.astype(compute_dtype)
        w_taps = w_taps.astype(compute_dtype)

    tap_offsets = tuple(kh * Wp + kw for kh in range(k) for kw in range(k))
    kernel = functools.partial(_arc_conv_kernel, TM=TM, TMH=TMH,
                               tap_offsets=tap_offsets)

    out_flat = pl.pallas_call(
        kernel,
        out_shape=jax.ShapeDtypeStruct((bs, Cout, Mpad), jnp.float32),
        grid=(bs, nM),
        in_specs=[
            pl.BlockSpec(memory_space=pl.ANY),                              # activations stay in HBM
            pl.BlockSpec((None, k * k, Cout, Cin), lambda b, m: (b, 0, 0, 0)),
        ],
        out_specs=pl.BlockSpec((None, Cout, TM), lambda b, m: (b, 0, m)),
        scratch_shapes=[
            pltpu.VMEM((Cin, TMH), xf.dtype),      # activation slab (taps are static views into it)
            pltpu.SemaphoreType.DMA(()),
        ],
        compiler_params=pltpu.CompilerParams(
            dimension_semantics=("parallel", "parallel"),
            vmem_limit_bytes=32 * 1024 * 1024),
    )(xf, w_taps)

    # Drop junk columns / padding; NCHW with no transpose.
    out = out_flat[:, :, :M].reshape(bs, Cout, Hout1, Wp)[:, :, :, :Wout1]
    if stride != 1:
        # TODO(synk): stride > 1 computes the stride-1 result and subsamples
        # (exact, but ~stride^2 extra work).
        out = out[:, :, ::stride, ::stride]
    return out


# ----------------------------------------------------------------------------
# Routing function (user-supplied module in PyTorch; simple deterministic one)
# ----------------------------------------------------------------------------
def make_routing_params(key, in_channels, kernel_number):
    k1, k2 = jax.random.split(key)
    Wa = jax.random.normal(k1, (in_channels, kernel_number), jnp.float32) * 0.1
    Wt = jax.random.normal(k2, (in_channels, kernel_number), jnp.float32) * 0.1
    return Wa, Wt


def routing_func(x, Wa, Wt):
    feat = x.mean(axis=(2, 3))                              # (bs, Cin)
    alphas = jax.nn.sigmoid(feat @ Wa)                      # (bs, n)
    angles = (math.pi / 2.0) * jnp.tanh(feat @ Wt)          # (bs, n)
    return alphas, angles


# ----------------------------------------------------------------------------
# Pure-JAX reference (for correctness check)
# ----------------------------------------------------------------------------
def ref_forward(x, weight, alphas, angles, *, stride=1, padding=1):
    bs, Cin, H, W = x.shape
    n, Cout, _, k, _ = weight.shape
    rot = _get_rotation_matrix(angles) * alphas[:, :, None, None]
    rot = jnp.transpose(rot, (0, 2, 1, 3)).reshape(bs * k * k, n * k * k)
    wmat = jnp.transpose(weight, (0, 3, 4, 1, 2)).reshape(n * k * k, Cout * Cin)
    rw = (rot @ wmat).reshape(bs, k, k, Cout, Cin)
    rw = jnp.transpose(rw, (0, 3, 4, 1, 2)).reshape(bs * Cout, Cin, k, k)
    xg = x.reshape(1, bs * Cin, H, W)
    o = lax.conv_general_dilated(
        xg, rw, window_strides=(stride, stride),
        padding=((padding, padding), (padding, padding)),
        dimension_numbers=("NCHW", "OIHW", "NCHW"), feature_group_count=bs,
    )
    return o.reshape(bs, Cout, o.shape[2], o.shape[3])


# ----------------------------------------------------------------------------
if __name__ == "__main__":
    bs, Cin, H, W = 2, 4, 16, 16
    Cout, kernel_number, k = 8, 4, 3

    key = jax.random.PRNGKey(0)
    kx, kw, kr = jax.random.split(key, 3)

    x = jax.random.normal(kx, (bs, Cin, H, W), jnp.float32)

    # kaiming_normal_(mode='fan_out') on the 5-D weight: fan_out = n * Cin * k * k
    fan_out = kernel_number * Cin * k * k
    std = math.sqrt(2.0 / fan_out)
    weight = jax.random.normal(kw, (kernel_number, Cout, Cin, k, k), jnp.float32) * std

    Wa, Wt = make_routing_params(kr, Cin, kernel_number)
    alphas, angles = routing_func(x, Wa, Wt)                 # (bs, n), (bs, n)

    # f32 path, stride 1
    out = jax.block_until_ready(
        adaptive_rotated_conv2d(x, weight, alphas, angles, stride=1, padding=1))
    ref = jax.block_until_ready(ref_forward(x, weight, alphas, angles, stride=1, padding=1))
    assert out.shape == (bs, Cout, H, W), out.shape
    np.testing.assert_allclose(np.asarray(out), np.asarray(ref), rtol=1e-4, atol=1e-4)

    # stride=2 (same kernel, exact subsampling of the stride-1 result)
    out_s2 = jax.block_until_ready(
        adaptive_rotated_conv2d(x, weight, alphas, angles, stride=2, padding=1))
    ref_s2 = jax.block_until_ready(ref_forward(x, weight, alphas, angles, stride=2, padding=1))
    np.testing.assert_allclose(np.asarray(out_s2), np.asarray(ref_s2), rtol=1e-4, atol=1e-4)

    # bf16 compute (v6e/v7x MXU path), f32 accumulate — loose tolerance sanity check
    out_bf = jax.block_until_ready(
        adaptive_rotated_conv2d(x, weight, alphas, angles, stride=1, padding=1,
                                compute_dtype=jnp.bfloat16))
    np.testing.assert_allclose(np.asarray(out_bf), np.asarray(ref), rtol=5e-2, atol=5e-2)

    print("KERNEL_OK")
</pallas_src>

<mosaic_0001>
module attributes {stable_mosaic.version = 11 : i64} {
  func.func @_rot_mm_kernel(%arg0: i32, %arg1: memref<18x36xf32, #tpu.memory_space<vmem>>, %arg2: memref<36x32xf32, #tpu.memory_space<vmem>>, %arg3: memref<18x32xf32, #tpu.memory_space<vmem>>) attributes {dimension_semantics = [#tpu.dimension_semantics<parallel>], iteration_bounds = array<i64: 1>, scalar_prefetch = 0 : i64, scratch_operands = 0 : i64, tpu.core_type = #tpu.core_type<tc>, window_params = [{pipeline_mode = #tpu.pipeline_mode<synchronous>, transform_indices = @transform_0, window_bounds = array<i64: 18, 36>}, {transform_indices = @transform_1, window_bounds = array<i64: 36, 32>}, {transform_indices = @transform_2, window_bounds = array<i64: 18, 32>}]} {
    %c0 = arith.constant 0 : index
    %c0_0 = arith.constant 0 : index
    %0 = vector.load %arg1[%c0, %c0_0] : memref<18x36xf32, #tpu.memory_space<vmem>>, vector<18x36xf32>
    %c0_1 = arith.constant 0 : index
    %c0_2 = arith.constant 0 : index
    %1 = vector.load %arg2[%c0_1, %c0_2] : memref<36x32xf32, #tpu.memory_space<vmem>>, vector<36x32xf32>
    %cst = arith.constant dense<0.000000e+00> : vector<18x32xf32>
    %2 = tpu.matmul %0, %1, %cst {dimension_numbers = #tpu.dot_dimension_numbers<[1], [0], [0], [1], [0, 0, 1, 1], [], []>} : vector<18x36xf32>, vector<36x32xf32>, vector<18x32xf32> -> vector<18x32xf32>
    %c0_3 = arith.constant 0 : index
    %c0_4 = arith.constant 0 : index
    %3 = vector.load %arg3[%c0_3, %c0_4] : memref<18x32xf32, #tpu.memory_space<vmem>>, vector<18x32xf32>
    tpu.vector_store %arg3[%c0_3, %c0_4], %2 {strides = array<i32>} : memref<18x32xf32, #tpu.memory_space<vmem>>, vector<18x32xf32>,
    return
  }
  func.func @transform_0(%arg0: i32) -> (i32, i32) {
    %c0_i32 = arith.constant 0 : i32
    %c0_i32_0 = arith.constant 0 : i32
    %c0_i32_1 = arith.constant 0 : i32
    return %c0_i32, %c0_i32_0 : i32, i32
  }
  func.func @transform_1(%arg0: i32) -> (i32, i32) {
    %c0_i32 = arith.constant 0 : i32
    %c0_i32_0 = arith.constant 0 : i32
    return %c0_i32, %arg0 : i32, i32
  }
  func.func @transform_2(%arg0: i32) -> (i32, i32) {
    %c0_i32 = arith.constant 0 : i32
    %c0_i32_0 = arith.constant 0 : i32
    return %c0_i32, %arg0 : i32, i32
  }
}

</mosaic_0001>

<bundles_post_ra>
// kernel: tpu_custom_call.1
= control target key start
LH: loop header
LB: loop body
LE: loop exit
PB: predicated region body
PF: predicated region fallthrough
CT: control target
= control target key end

     0   :  { %v208_v3 = vmov 0.0|0.0   ;;  %vm209_vm0 = vmmov 0   ;;  %v210_v6 = vmov 0.0   ;;  %s268_s0 = inlined_call_operand.vmem [shape: f32[18,36], index: 0, kind: input, shape index: {}]   ;;  %s269_s1 = inlined_call_operand.vmem [shape: f32[36,32], index: 1, kind: input, shape index: {}]   ;;  %s270_s2 = inlined_call_operand.hbm [shape: f32[18,32], index: 2, kind: output, shape index: {}]  }
   0x1   :  { %v15_v0 = vld [vmem:[%s269_s1] sm:$0xff]  ;;  %v16_v1 = vld [vmem:[%s269_s1 + $0x8] sm:$0xff]  ;;  %v17_v2 = vld [vmem:[%s269_s1 + $0x10] sm:$0xff]  ;;  %172 = vmatprep.subr.bf16.mxu1 %v208_v3  ;;  %166 = vmatprep.subr.bf16.mxu0 %v208_v3 }
   0x2   :  { %v167_v4 = vpack.c.bf16 %v16_v1, %v15_v0  ;;  %v18_v5 = vld [vmem:[%s269_s1 + $0x18] sm:$0xff]  ;;  %160 = vmatprep.mubr.msk.f32.mxu1 %vm209_vm0, %v210_v6  ;;  %157 = vmatprep.mubr.msk.f32.mxu0 %vm209_vm0, %v210_v6 }
   0x3   :  { %7 = vsyncpa [#allocation3], 0  ;;  %v170_v7 = vpack.c.bf16 %v18_v5, %v17_v2  ;;  %v19_v8 = vld [vmem:[%s269_s1 + $0x20] sm:$0xf]  ;;  %vm30_vm1 = vcmask 1043456   ;;  %v13_v9 = vld [vmem:[%s268_s0 + $0x8] sm:$0xff] }
   0x4   :  { %175 = vmatpush3.bf16.msra.mxu1 %v167_v4  ;;  %168 = vmatpush3.bf16.msra.mxu0 %v167_v4  ;;  %vm20_vm2 = vcmask 293888   ;;  %v12_v10 = vld [vmem:[%s268_s0] sm:$0xff]  ;;  %v14_v11 = vld [vmem:[%s268_s0 + $0x10] sm:$0x3]  ;;  %vm114_vm3 = vcmask 261120   ;;  %s211_s1 = smov [#allocation2]  }
   0x5   :  { %173 = vmatprep.subr.bf16.mxu1 %v208_v3  ;;  %169 = vmatprep.subr.bf16.mxu0 %v208_v3  ;;  %s124_s25 = sshll.u32 %s211_s1, 4  ;;  %vm117_vm4 = vcmask 254976   ;;  %s125_s25 = int_to_ptr.vmem [resolvable:$true] %s124_s25 }
   0x6   :  { %s184_s26 = scalar_lea.vmem %s125_s25, 384  ;;  %p189_p1 = scmp.lt.s32.totalorder %s125_s25, %s125_s25 }
   0x7   :  { %p185_p0 = scmp.ne.s32.totalorder %s125_s25, %s184_s26  ;;  %p190_p2 = scmp.lt.s32.totalorder %s184_s26, %s184_s26 }
   0x8   :  { %176 = vmatpush3.bf16.msra.mxu1 %v170_v7  ;;  %171 = vmatpush3.bf16.msra.mxu0 %v170_v7 }
   0x9   :  { %174 = vmatprep.subr.mxu1 %v210_v6  ;;  %155 = vmatprep.subr.mxu0 %v210_v6  ;;  %p191_p3 = por %p190_p2, %p189_p1 }
   0xb   :  { %p192_p4 = pnand %p191_p3, %p185_p0 }
   0xc   :  { %177 = vmatpush3.msk.msra.mxu1 %vm30_vm1, %v19_v8  ;;  %156 = vmatpush3.msk.msra.mxu0 %vm30_vm1, %v19_v8 }
   0xd   :  { %161 = vmatmul.mubr.msk.f32.vlgmr.msra.gmra.mrb[0].mxu1 %vm20_vm2, %v13_v9  ;;  %158 = vmatmul.mubr.msk.f32.vlgmr.msra.gmra.mrb[0].mxu0 %vm20_vm2, %v12_v10 }
   0xe   :  { %163 = vmatprep.mubr.msk.f32.mxu1 %vm209_vm0, %v210_v6 }
  0x11   :  { %164 = vmatmul.mubr.msk.f32.gmra.mrb[2].mxu1 %vm20_vm2, %v14_v11 }
  0xe0   :  { %v105_v12 = vpop.f32.mrb[0].mxu1  ;;  %v100_v13 = vpop.f32.mrb[0].mxu0 }
  0xe1   :  { %116 = vst.msk [vmem:[#allocation2 + $0x8] sm:$0xff] %vm114_vm3, %v105_v12  ;;  %v162_v14 = vpop.f32.mrb[1].mxu1  ;;  %115 = vst.msk [vmem:[#allocation2] sm:$0xff] %vm114_vm3, %v100_v13  ;;  %v159_v15 = vpop.f32.mrb[1].mxu0 }
  0xe4   :  { %v110_v16 = vpop.f32.mrb[2].mxu1 }
  0xe5   :  { %118 = vst.msk [vmem:[#allocation2 + $0x10] sm:$0x3] %vm117_vm4, %v110_v16  ;;  %v165_v17 = vpop.f32.mrb[3].mxu1 }
  0xe6   :  { %195 = shalt.err (!%p192_p4)
}
  0xe7   :  { %s196_s28 = scalar_lea.hbm %s270_s2, 384 }
  0xe8   :  { %p197_p5 = scmp.ne.s32.totalorder %s270_s2, %s196_s28  ;;  %p200_p6 = scmp.lt.u32.totalorder %s196_s28, %s270_s2 }
  0xea   :  { %p202_p7 = pnand %p200_p6, %p197_p5 }
  0xec   :  { %205 = shalt.err (!%p202_p7)
}
  0xed   :  { %s212_s5 = smov 128   ;;  %s213_s6 = smov 8  }
  0xee   :  { %130 = dma.vmem_to_hbm [thread:$0]  %s125_s25, 384, %s270_s2, [#allocation3], %s212_s5, %s212_s5, %s213_s6  }
  0xef   :  { %206 = dma.done.wait [#allocation3], 384  }
  0xf0   :  { %207 = vsyncadd [#allocation3], 4294966912 }
  0xf1   :  { %134 = vsyncpa [#allocation3], 1 }

</bundles_post_ra>
